<compile_context>
chip_gen: v7x
topology: tpu7x:2x2x1
jax: 0.10.0
libtpu: 0.0.40
codegen_flags: <defaults>
</compile_context>

<pallas_src>
import functools
import math

import jax
import jax.numpy as jnp
from jax import lax
from jax.experimental import pallas as pl
from jax.experimental.pallas import tpu as pltpu

HIDDEN_SIZE = 256   # module-level `hidden_size`; the sqrt scale uses this global (as in PyTorch)
SEQ_LEN = 8
LANE = 128          # TPU lane width — lane-dense stores avoid masked vst.msk


def _round_up(x, m):
    return pl.cdiv(x, m) * m


# ---------------------------------------------------------------------------
# B = 1 (module-faithful) kernels: VPU scores, exact softmax, lane-dense output
# ---------------------------------------------------------------------------

def _b1_softmax(h_ref, e_ref, scale):
    """Shared B=1 body. Returns (p_col (S, 1), e (S, H))."""
    h = h_ref[...]                                              # (1, H)
    e = e_ref[...]                                              # (S, H)
    # energies[s] = <h, e[s]> * scale — VPU broadcast-mul + XLU lane reduce (no MXU)
    energies = jnp.sum(h * e, axis=-1, keepdims=True) * scale   # (S, 1)
    m = jnp.max(energies, axis=0, keepdims=True)                # (1, 1)
    ex = jnp.exp(energies - m)                                  # EUP
    denom = jnp.sum(ex, axis=0, keepdims=True)                  # (1, 1)
    p = ex / denom                                              # exact divide (sum(p) == 1)
    return p, e


def _attn_b1_kernel(h_ref, e_ref, w_ref, *, scale):
    p, _ = _b1_softmax(h_ref, e_ref, scale)
    # Lane-broadcast so the single output store is a full unmasked (S, 128) vreg.
    w_ref[...] = jnp.broadcast_to(p, w_ref.shape)


def _attn_b1_ctx_kernel(h_ref, e_ref, w_ref, c_ref, *, scale):
    p, e = _b1_softmax(h_ref, e_ref, scale)
    w_ref[...] = jnp.broadcast_to(p, w_ref.shape)
    # Fused context vector ctx = sum_s p[s] * e[s, :] — reuses the encoder tile in VMEM.
    c_ref[...] = jnp.sum(p * e, axis=0, keepdims=True)          # (1, H)


def _attn_call_b1(hidden2d, enc2d, with_context):
    B, H = hidden2d.shape
    S = enc2d.shape[0]
    assert B == 1
    scale = 1.0 / math.sqrt(HIDDEN_SIZE)   # module uses the *global* hidden_size for the scale

    cost = pl.CostEstimate(
        flops=2 * S * H + (2 * S * H if with_context else 0),
        transcendentals=S,
        bytes_accessed=(H + S * H + S * LANE + (H if with_context else 0)) * 4,
    )

    in_specs = [pl.BlockSpec((B, H), lambda: (0, 0)),
                pl.BlockSpec((S, H), lambda: (0, 0))]

    if with_context:
        kernel = functools.partial(_attn_b1_ctx_kernel, scale=scale)
        w_slab, ctx = pl.pallas_call(
            kernel,
            out_shape=(jax.ShapeDtypeStruct((S, LANE), jnp.float32),
                       jax.ShapeDtypeStruct((B, H), jnp.float32)),
            in_specs=in_specs,
            out_specs=(pl.BlockSpec((S, LANE), lambda: (0, 0)),
                       pl.BlockSpec((B, H), lambda: (0, 0))),
            cost_estimate=cost,
        )(hidden2d, enc2d)
        return w_slab[:, 0], ctx

    kernel = functools.partial(_attn_b1_kernel, scale=scale)
    w_slab = pl.pallas_call(
        kernel,
        out_shape=jax.ShapeDtypeStruct((S, LANE), jnp.float32),
        in_specs=in_specs,
        out_specs=pl.BlockSpec((S, LANE), lambda: (0, 0)),
        cost_estimate=cost,
    )(hidden2d, enc2d)
    return w_slab[:, 0], None


def scaled_dot_prod_attn(hidden, encoder_outputs, return_context=False):
    """Module-faithful forward.

    hidden: (1, H) f32; encoder_outputs: (S, 1, H) f32 -> (1, 1, S) f32.
    If return_context=True, also returns the fused context vector (1, H) f32
    (= attn_weights @ encoder_outputs) computed in the same kernel.
    """
    S = encoder_outputs.shape[0]
    H = hidden.shape[1]
    enc = encoder_outputs.reshape(S, H)          # squeeze singleton batch dim (glue, plain JAX)
    weights, ctx = _attn_call_b1(hidden, enc, with_context=return_context)
    out = weights.reshape(1, 1, S)               # .unsqueeze(0).unsqueeze(0)
    if return_context:
        return out, ctx
    return out


# ---------------------------------------------------------------------------
# Batched path: amortize launch/DMA cost over B decoder steps / beams (MXU path)
# ---------------------------------------------------------------------------

def _attn_batched_kernel(h_ref, e_ref, w_ref, c_ref, *, scale, seq_len):
    h = h_ref[...]                                   # (TB, H)
    e = e_ref[...]                                   # (S_pad, H); rows >= seq_len are zero-padded
    energies = lax.dot_general(
        h, e, dimension_numbers=(((1,), (1,)), ((), ())),
        precision=lax.Precision.HIGHEST,
        preferred_element_type=jnp.float32) * scale  # (TB, S_pad) on the MXU
    lane = lax.broadcasted_iota(jnp.int32, energies.shape, 1)
    energies = jnp.where(lane < seq_len, energies, -jnp.inf)
    m = jnp.max(energies, axis=-1, keepdims=True)
    ex = jnp.exp(energies - m)
    p = ex / jnp.sum(ex, axis=-1, keepdims=True)     # exact; pad lanes come out exactly 0
    w_ref[...] = p                                   # lane-dense unmasked store (TB, S_pad)
    c_ref[...] = lax.dot_general(                    # fused context (TB, H)
        p, e, dimension_numbers=(((1,), (0,)), ((), ())),
        precision=lax.Precision.HIGHEST,
        preferred_element_type=jnp.float32)


def scaled_dot_prod_attn_batched(hidden_batch, encoder_outputs):
    """Amortized path: B decoder steps / beams in one launch.

    hidden_batch: (B, H) f32; encoder_outputs: (S, 1, H) f32
    returns (weights (B, S) f32, ctx (B, H) f32).
    """
    B, H = hidden_batch.shape
    S = encoder_outputs.shape[0]
    enc = encoder_outputs.reshape(S, H)
    scale = 1.0 / math.sqrt(HIDDEN_SIZE)

    S_pad = _round_up(max(S, LANE), LANE)                 # lane-dense weights slab
    enc_pad = jnp.zeros((S_pad, H), jnp.float32).at[:S].set(enc)

    TB = min(_round_up(B, 8), 128)                        # sublane-aligned M tile
    Bp = _round_up(B, TB)
    h_pad = jnp.zeros((Bp, H), jnp.float32).at[:B].set(hidden_batch)

    kernel = functools.partial(_attn_batched_kernel, scale=scale, seq_len=S)
    weights, ctx = pl.pallas_call(
        kernel,
        out_shape=(jax.ShapeDtypeStruct((Bp, S_pad), jnp.float32),
                   jax.ShapeDtypeStruct((Bp, H), jnp.float32)),
        grid=(Bp // TB,),
        in_specs=[pl.BlockSpec((TB, H), lambda i: (i, 0)),
                  pl.BlockSpec((S_pad, H), lambda i: (0, 0))],
        out_specs=(pl.BlockSpec((TB, S_pad), lambda i: (i, 0)),
                   pl.BlockSpec((TB, H), lambda i: (i, 0))),
        compiler_params=pltpu.CompilerParams(dimension_semantics=("parallel",)),
    )(h_pad, enc_pad)
    return weights[:B, :S], ctx[:B]


# ---------------------------------------------------------------------------
# Params / reference
# ---------------------------------------------------------------------------

def init_params(key, hidden_size_):
    # TODO(synk): self.attn = nn.Linear(hidden_size, hidden_size) is defined in __init__
    # but never used in forward(); params are created for shape fidelity only.
    kw, kb = jax.random.split(key)
    bound = 1.0 / math.sqrt(hidden_size_)
    w = jax.random.uniform(kw, (hidden_size_, hidden_size_), jnp.float32, -bound, bound)
    b = jax.random.uniform(kb, (hidden_size_,), jnp.float32, -bound, bound)
    return {"attn_w": w, "attn_b": b}


def reference(hidden, encoder_outputs):
    """Pure-JAX reference mirroring the PyTorch forward exactly."""
    S = encoder_outputs.shape[0]
    enc = encoder_outputs.reshape(S, -1)
    energies = (hidden @ enc.T) / math.sqrt(HIDDEN_SIZE)      # (1, S)
    return jax.nn.softmax(energies[0])[None, None, :]


if __name__ == "__main__":
    key = jax.random.PRNGKey(0)
    k_h, k_e, k_b, k_p = jax.random.split(key, 4)

    params = init_params(k_p, HIDDEN_SIZE)   # defined-but-unused, as in the PyTorch module

    hidden = jax.random.normal(k_h, (1, HIDDEN_SIZE), jnp.float32)
    encoder_outputs = jax.random.normal(k_e, (SEQ_LEN, 1, HIDDEN_SIZE), jnp.float32)
    enc2d = encoder_outputs.reshape(SEQ_LEN, HIDDEN_SIZE)

    # --- module-faithful forward (single lane-dense output DMA, no ctx) ---
    out = jax.block_until_ready(scaled_dot_prod_attn(hidden, encoder_outputs))
    ref = reference(hidden, encoder_outputs)
    assert out.shape == (1, 1, SEQ_LEN), out.shape
    assert jnp.allclose(out, ref, atol=1e-5, rtol=1e-5), (out, ref)
    assert jnp.allclose(jnp.sum(out), 1.0, atol=1e-5)

    # --- optional fused context (extra output only when requested) ---
    out2, ctx = scaled_dot_prod_attn(hidden, encoder_outputs, return_context=True)
    out2, ctx = jax.block_until_ready((out2, ctx))
    ref_ctx = ref.reshape(1, SEQ_LEN) @ enc2d
    assert ctx.shape == (1, HIDDEN_SIZE), ctx.shape
    assert jnp.allclose(out2, ref, atol=1e-5, rtol=1e-5)
    assert jnp.allclose(ctx, ref_ctx, atol=1e-4, rtol=1e-4), (ctx, ref_ctx)

    # --- amortized batched path (B beams / decoder steps in one launch) ---
    B = 8
    hidden_batch = jax.random.normal(k_b, (B, HIDDEN_SIZE), jnp.float32)
    w_b, ctx_b = jax.block_until_ready(
        scaled_dot_prod_attn_batched(hidden_batch, encoder_outputs))
    ref_w_b = jax.nn.softmax(hidden_batch @ enc2d.T / math.sqrt(HIDDEN_SIZE), axis=-1)
    ref_ctx_b = ref_w_b @ enc2d
    assert w_b.shape == (B, SEQ_LEN) and ctx_b.shape == (B, HIDDEN_SIZE)
    assert jnp.allclose(w_b, ref_w_b, atol=1e-4, rtol=1e-4), (w_b, ref_w_b)
    assert jnp.allclose(ctx_b, ref_ctx_b, atol=1e-3, rtol=1e-3), (ctx_b, ref_ctx_b)

    print("KERNEL_OK")
</pallas_src>

<mosaic_0001>
module attributes {stable_mosaic.version = 11 : i64} {
  func.func @_attn_b1_kernel(%arg0: memref<1x256xf32, #tpu.memory_space<vmem>>, %arg1: memref<8x256xf32, #tpu.memory_space<vmem>>, %arg2: memref<8x128xf32, #tpu.memory_space<vmem>>) attributes {dimension_semantics = [], scalar_prefetch = 0 : i64, scratch_operands = 0 : i64, tpu.core_type = #tpu.core_type<tc>} {
    %c0 = arith.constant 0 : index
    %c0_0 = arith.constant 0 : index
    %0 = vector.load %arg0[%c0, %c0_0] : memref<1x256xf32, #tpu.memory_space<vmem>>, vector<1x256xf32>
    %c0_1 = arith.constant 0 : index
    %c0_2 = arith.constant 0 : index
    %1 = vector.load %arg1[%c0_1, %c0_2] : memref<8x256xf32, #tpu.memory_space<vmem>>, vector<8x256xf32>
    %2 = vector.broadcast %0 : vector<1x256xf32> to vector<8x256xf32>
    %3 = arith.mulf %2, %1 : vector<8x256xf32>
    %cst = arith.constant dense<0.000000e+00> : vector<8xf32>
    %4 = vector.multi_reduction <add>, %3, %cst [1] : vector<8x256xf32> to vector<8xf32>
    %5 = vector.shape_cast %4 : vector<8xf32> to vector<8x1xf32>
    %cst_3 = arith.constant 6.250000e-02 : f32
    %6 = vector.broadcast %cst_3 : f32 to vector<8x1xf32>
    %7 = arith.mulf %5, %6 : vector<8x1xf32>
    %cst_4 = arith.constant dense<0xFF800000> : vector<1xf32>
    %8 = vector.multi_reduction <maximumf>, %7, %cst_4 [0] : vector<8x1xf32> to vector<1xf32>
    %9 = vector.shape_cast %8 : vector<1xf32> to vector<1x1xf32>
    %10 = vector.broadcast %9 : vector<1x1xf32> to vector<8x1xf32>
    %11 = arith.subf %7, %10 : vector<8x1xf32>
    %12 = math.exp %11 : vector<8x1xf32>
    %cst_5 = arith.constant dense<0.000000e+00> : vector<1xf32>
    %13 = vector.multi_reduction <add>, %12, %cst_5 [0] : vector<8x1xf32> to vector<1xf32>
    %14 = vector.shape_cast %13 : vector<1xf32> to vector<1x1xf32>
    %15 = vector.broadcast %14 : vector<1x1xf32> to vector<8x1xf32>
    %16 = arith.divf %12, %15 : vector<8x1xf32>
    %17 = vector.shape_cast %16 : vector<8x1xf32> to vector<8x1xf32>
    %18 = vector.broadcast %17 : vector<8x1xf32> to vector<8x128xf32>
    %c0_6 = arith.constant 0 : index
    %c0_7 = arith.constant 0 : index
    %19 = vector.load %arg2[%c0_6, %c0_7] : memref<8x128xf32, #tpu.memory_space<vmem>>, vector<8x128xf32>
    tpu.vector_store %arg2[%c0_6, %c0_7], %18 {strides = array<i32>} : memref<8x128xf32, #tpu.memory_space<vmem>>, vector<8x128xf32>,
    return
  }
}

</mosaic_0001>

<bundles_post_ra>
// kernel: tpu_custom_call.1
= control target key start
LH: loop header
LB: loop body
LE: loop exit
PB: predicated region body
PF: predicated region fallthrough
CT: control target
= control target key end

     0   :  { %7 = vsyncpa [#allocation3], 0  ;;  %s223_s0 = inlined_call_operand.hbm [shape: f32[1,256], index: 0, kind: input, shape index: {}]   ;;  %s224_s1 = inlined_call_operand.hbm [shape: f32[8,256], index: 1, kind: input, shape index: {}]   ;;  %s225_s2 = inlined_call_operand.hbm [shape: f32[8,128], index: 2, kind: output, shape index: {}]  }
   0x1   :  { %8 = vsyncpa [#allocation6], 0 }
   0x2   :  { %9 = vsyncpa [#allocation4], 0  ;;  %s169_s9 = smov [#allocation2]   ;;  %s170_s11 = smov [#allocation5]  }
   0x3   :  { %s16_s10 = sshll.u32 %s169_s9, 4  ;;  %s26_s12 = sshll.u32 %s170_s11, 4  ;;  %s17_s10 = int_to_ptr.vmem [resolvable:$true] %s16_s10  ;;  %s27_s12 = int_to_ptr.vmem [resolvable:$true] %s26_s12 }
   0x4   :  { %s97_s15 = scalar_lea.hbm %s223_s0, 32 }
   0x5   :  { %p98_p0 = scmp.ne.s32.totalorder %s223_s0, %s97_s15  ;;  %p101_p1 = scmp.lt.u32.totalorder %s97_s15, %s223_s0 }
   0x7   :  { %p103_p2 = pnand %p101_p1, %p98_p0 }
   0x9   :  { %106 = shalt.err (!%p103_p2)
}
   0xa   :  { %s107_s20 = scalar_lea.vmem %s17_s10, 32  ;;  %p112_p4 = scmp.lt.s32.totalorder %s17_s10, %s17_s10 }
   0xb   :  { %p108_p3 = scmp.ne.s32.totalorder %s17_s10, %s107_s20  ;;  %p113_p5 = scmp.lt.s32.totalorder %s107_s20, %s107_s20 }
   0xd   :  { %p114_p6 = por %p113_p5, %p112_p4 }
   0xf   :  { %p115_p7 = pnand %p114_p6, %p108_p3 }
  0x11   :  { %118 = shalt.err (!%p115_p7)
}
  0x12   :  { %19 = dma.hbm_to_vmem [thread:$0]  %s223_s0, 32, %s17_s10, [#allocation3]  }
  0x13   :  { %s119_s25 = scalar_lea.hbm %s224_s1, 256 }
  0x14   :  { %p120_p8 = scmp.ne.s32.totalorder %s224_s1, %s119_s25  ;;  %p123_p9 = scmp.lt.u32.totalorder %s119_s25, %s224_s1 }
  0x16   :  { %p125_p10 = pnand %p123_p9, %p120_p8 }
  0x18   :  { %128 = shalt.err (!%p125_p10)
}
  0x19   :  { %s129_s30 = scalar_lea.vmem %s27_s12, 256  ;;  %p134_p12 = scmp.lt.s32.totalorder %s27_s12, %s27_s12 }
  0x1a   :  { %p130_p11 = scmp.ne.s32.totalorder %s27_s12, %s129_s30  ;;  %p135_p13 = scmp.lt.s32.totalorder %s129_s30, %s129_s30 }
  0x1c   :  { %p136_p0 = por %p135_p13, %p134_p12 }
  0x1e   :  { %p137_p1 = pnand %p136_p0, %p130_p11 }
  0x20   :  { %140 = shalt.err (!%p137_p1)
}
  0x21   :  { %29 = dma.hbm_to_vmem [thread:$0]  %s224_s1, 256, %s27_s12, [#allocation6]  }
  0x22   :  { %163 = dma.done.wait [#allocation3], 32  }
  0x23   :  { %164 = vsyncadd [#allocation3], 4294967264 }
  0x24   :  { %165 = dma.done.wait [#allocation6], 256  }
  0x25   :  { %166 = vsyncadd [#allocation6], 4294967040  ;;  %v40_v0 = vlaneseq  ;;  %v36_v4 = vld [vmem:[#allocation2] sm:$0x3]  ;;  %v37_v5 = vld [vmem:[#allocation5] sm:$0xff]  ;;  %s171_s1 = smov [#allocation7]  }
  0x26   :  { %v38_v6 = vld [vmem:[#allocation5 + $0x8] sm:$0xff]  ;;  %s80_s4 = sshll.u32 %s171_s1, 4  ;;  %s81_s4 = int_to_ptr.vmem [resolvable:$true] %s80_s4 }
  0x27   :  { %v41_v1 = vshrl.u32 %v40_v0, 7  ;;  %s141_s5 = scalar_lea.vmem %s81_s4, 128  ;;  %p146_p3 = scmp.lt.s32.totalorder %s81_s4, %s81_s4 }
  0x28   :  { %p142_p2 = scmp.ne.s32.totalorder %s81_s4, %s141_s5  ;;  %p147_p4 = scmp.lt.s32.totalorder %s141_s5, %s141_s5 }
  0x29   :  { %v42_v2 = vsub.s32 0, %v41_v1  ;;  %v46_v3 = vsub.s32 1, %v41_v1 }
  0x2a   :  { %p148_p5 = por %p147_p4, %p146_p3 }
  0x2b   :  { %v43_v7 = vrot.slane %v36_v4, %v42_v2  ;;  %v47_v8 = vrot.slane %v36_v4, %v46_v3 }
  0x2c   :  { %p149_p6 = pnand %p148_p5, %p142_p2 }
  0x2d   :  { %v50_v9 = vmul.f32 %v43_v7, %v37_v5  ;;  %v51_v10 = vmul.f32 %v47_v8, %v38_v6 }
  0x2f   :  { %v52_v11 = vadd.f32 %v51_v10, %v50_v9 }
  0x31   :  { %53 = vadd.xlane.f32.xlu0 %v52_v11 }
  0xbe   :  { %v54_v12 = vpop.xlane.xlu0 %53 }
  0xbf   :  { %v55_v13 = vmul.f32 0.0625, %v54_v12 }
  0xc1   :  { %v56_v14 = vrot.slane %v55_v13, 4 }
  0xc3   :  { %v57_v15 = vmax.f32 %v55_v13, %v56_v14 }
  0xc5   :  { %v58_v16 = vrot.slane %v57_v15, 2 }
  0xc7   :  { %v59_v17 = vmax.f32 %v57_v15, %v58_v16 }
  0xc9   :  { %v60_v18 = vrot.slane %v59_v17, 1 }
  0xcb   :  { %v61_v19 = vmax.f32 %v59_v17, %v60_v18 }
  0xcd   :  { %v62_v20 = vsub.f32 %v55_v13, %v61_v19 }
  0xcf   :  { %v63_v21 = vmul.f32 1.442695, %v62_v20 }
  0xd1   :  { %93 = vpow2.f32 %v63_v21 }
  0xdb   :  { %v94_v22 = vpop.eup %93 }
  0xdc   :  { %v65_v23 = vrot.slane %v94_v22, 4 }
  0xde   :  { %v66_v24 = vadd.f32 %v94_v22, %v65_v23 }
  0xe0   :  { %v67_v25 = vrot.slane %v66_v24, 2 }
  0xe2   :  { %v68_v26 = vadd.f32 %v67_v25, %v66_v24 }
  0xe4   :  { %v69_v27 = vrot.slane %v68_v26, 1 }
  0xe6   :  { %v70_v28 = vadd.f32 %v69_v27, %v68_v26 }
  0xe8   :  { %95 = vrcp.f32 %v70_v28 }
  0xf2   :  { %v96_v29 = vpop.eup %95 }
  0xf3   :  { %v72_v30 = vmul.f32 %v96_v29, %v94_v22 }
  0xf5   :  { %73 = vst [vmem:[#allocation7] sm:$0xff] %v72_v30 }
  0xf6   :  { %152 = shalt.err (!%p149_p6)
}
  0xf7   :  { %s153_s8 = scalar_lea.hbm %s225_s2, 128 }
  0xf8   :  { %p154_p7 = scmp.ne.s32.totalorder %s225_s2, %s153_s8  ;;  %p157_p8 = scmp.lt.u32.totalorder %s153_s8, %s225_s2 }
  0xfa   :  { %p159_p9 = pnand %p157_p8, %p154_p7 }
  0xfc   :  { %162 = shalt.err (!%p159_p9)
}
  0xfd   :  { %83 = dma.vmem_to_hbm [thread:$0]  %s81_s4, 128, %s225_s2, [#allocation4]  }
  0xfe   :  { %167 = dma.done.wait [#allocation4], 128  }
  0xff   :  { %168 = vsyncadd [#allocation4], 4294967168 }
 0x100   :  { %87 = vsyncpa [#allocation3], 1 }
 0x101   :  { %88 = vsyncpa [#allocation6], 1 }
 0x102   :  { %89 = vsyncpa [#allocation4], 1 }

</bundles_post_ra>
